<compile_context>
chip_gen: v5e
topology: v5e:2x2
jax: 0.10.0
libtpu: 0.0.40
codegen_flags: <defaults>
</compile_context>

<pallas_src>
import jax
import jax.numpy as jnp
from jax.experimental import pallas as pl
from jax.experimental.pallas import tpu as pltpu

# ---------------------------------------------------------------------------
# Model hyper-parameters (small, consistent with the module's expectations).
# ---------------------------------------------------------------------------
B = 2          # batch
S = 8          # sequence length
D = 32         # d_model ("size" in EncoderLayer)
H = 4          # attention heads
DK = D // H    # per-head dim
F = 64         # feed-forward hidden dim
EPS = 1e-6     # LayerNorm eps
N = B * S      # flattened rows (also the merged-attention score extent)

assert N <= D, "bias rows are packed into the (.., D) activation slab"


def _layer_norm(x, gamma, beta):
    """Annotated-Transformer LayerNorm (unbiased std), fused one-pass stats.

    Single-pass sum / sum-of-squares is fine for D=32 f32 at these activation
    scales (see review correctness note); reciprocal goes to the EUP slot.
    """
    s1 = jnp.sum(x, axis=-1, keepdims=True)            # sum(x)
    s2 = jnp.sum(x * x, axis=-1, keepdims=True)        # sum(x^2)
    mean = s1 * (1.0 / D)
    # unbiased variance: (sum(x^2) - D*mean^2) / (D-1); note D*mean^2 == mean*s1
    var = jnp.maximum(s2 - mean * s1, 0.0) * (1.0 / (D - 1))
    inv = pl.reciprocal(jnp.sqrt(var) + EPS, approx=True)   # EUP, frees VALU
    return gamma * ((x - mean) * inv) + beta


def encoder_layer_kernel(xa_ref, w_ref, vec_ref, out_ref):
    # Activation slab: rows [0,N) = x (flattened batch), rows [N,2N) cols [0,N)
    # = precomputed additive attention bias (cross-batch -1e9 + padding -1e9).
    x = xa_ref[0:N, :]                                  # (N, D)
    bias = xa_ref[N:2 * N, 0:N]                         # (N, N)

    # ---- parameter views: static, sublane(8)-aligned slices of the slabs ----
    wqkv = w_ref[0:D, :]                                # (D, 3D) fused Wq*s|Wk|Wv
    w1 = w_ref[2 * D:3 * D, 0:F]                        # (D, F)
    w2 = w_ref[3 * D:3 * D + F, 0:D]                    # (F, D)
    bqkv = vec_ref[0:1, 0:3 * D]                        # (1, 3D)  (bq pre-scaled)
    bo = vec_ref[1:2, 0:D]
    b1 = vec_ref[2:3, 0:F]
    b2 = vec_ref[3:4, 0:D]
    ln1g = vec_ref[4:5, 0:D]
    ln1b = vec_ref[5:6, 0:D]
    ln2g = vec_ref[6:7, 0:D]
    ln2b = vec_ref[7:8, 0:D]

    # ---------------- sublayer 0: x + self_attn(LayerNorm1(x), mask) --------
    n1 = _layer_norm(x, ln1g, ln1b)                     # (N, D)
    # 1/sqrt(dk) is already folded into Wq / bq at pack time.
    qkv = jnp.dot(n1, wqkv, preferred_element_type=jnp.float32) + bqkv  # (N, 3D)

    acc = None
    for h in range(H):                                  # static unroll, H = 4
        c0 = h * DK
        qh = qkv[:, c0:c0 + DK]                         # (N, DK) both batches stacked
        kh = qkv[:, D + c0:D + c0 + DK]                 # (N, DK)
        vh = qkv[:, 2 * D + c0:2 * D + c0 + DK]         # (N, DK)
        # QK^T without an explicit transpose: contract last dim of both.
        s = jax.lax.dot_general(qh, kh, (((1,), (1,)), ((), ())),
                                preferred_element_type=jnp.float32)     # (N, N)
        s = s + bias                                    # block + padding mask
        s = s - jnp.max(s, axis=-1, keepdims=True)
        p = jnp.exp(s)                                  # cross-batch entries -> 0
        p = p * pl.reciprocal(jnp.sum(p, axis=-1, keepdims=True), approx=True)
        head = jnp.dot(p, vh, preferred_element_type=jnp.float32)       # (N, DK)
        # concat(heads) @ Wo  ==  sum_h head_h @ Wo[h*DK:(h+1)*DK, :]
        wo_h = w_ref[D + c0:D + c0 + DK, 0:D]           # (DK, D) row-block of Wo
        contrib = jnp.dot(head, wo_h, preferred_element_type=jnp.float32)
        acc = contrib if acc is None else acc + contrib

    # TODO(synk): dropout omitted (eval-mode / inference semantics).
    x1 = x + acc + bo                                   # (N, D)

    # ---------------- sublayer 1: x + feed_forward(LayerNorm2(x)) -----------
    n2 = _layer_norm(x1, ln2g, ln2b)
    hdn = jnp.maximum(jnp.dot(n2, w1, preferred_element_type=jnp.float32) + b1, 0.0)
    ff = jnp.dot(hdn, w2, preferred_element_type=jnp.float32) + b2

    out_ref[...] = x1 + ff


# ---------------------------------------------------------------------------
# Load-time packing (done ONCE, not per call).
# ---------------------------------------------------------------------------
def _pack_params(params):
    """Pack the 16 parameter arrays into one matrix slab + one vector slab.

    Matrix slab (3D+F, 3D), every placement sublane(8)-aligned, cols from 0:
      rows [0,   D)  cols [0, 3D) : fused [Wq/sqrt(dk) | Wk | Wv]
      rows [D,  2D)  cols [0,  D) : Wo
      rows [2D, 3D)  cols [0,  F) : W1
      rows [3D,3D+F) cols [0,  D) : W2
    Vector slab (8, 128) — exactly one vreg — one packed vector per row.
    1/sqrt(dk) is folded into Wq and bq here (free constant folding).
    """
    (wq, bq, wk, bk, wv, bv, wo, bo,
     w1, b1, w2, b2, ln1g, ln1b, ln2g, ln2b) = params
    scale = 1.0 / (float(DK) ** 0.5)

    w_slab = jnp.zeros((3 * D + F, 3 * D), jnp.float32)
    w_slab = w_slab.at[0:D, :].set(jnp.concatenate([wq * scale, wk, wv], axis=1))
    w_slab = w_slab.at[D:2 * D, 0:D].set(wo)
    w_slab = w_slab.at[2 * D:3 * D, 0:F].set(w1)
    w_slab = w_slab.at[3 * D:3 * D + F, 0:D].set(w2)

    vec = jnp.zeros((8, 128), jnp.float32)
    vec = vec.at[0, 0:3 * D].set(jnp.concatenate([bq[0] * scale, bk[0], bv[0]]))
    vec = vec.at[1, 0:D].set(bo[0])
    vec = vec.at[2, 0:F].set(b1[0])
    vec = vec.at[3, 0:D].set(b2[0])
    vec = vec.at[4, 0:D].set(ln1g[0])
    vec = vec.at[5, 0:D].set(ln1b[0])
    vec = vec.at[6, 0:D].set(ln2g[0])
    vec = vec.at[7, 0:D].set(ln2b[0])
    return w_slab, vec


def _attn_bias(mask):
    """Merged-batch (N, N) additive bias: padding -1e9 on masked key columns of
    the same batch element, -1e9 on all cross-batch quadrants (block-diagonal)."""
    pad = jnp.where(mask > 0, 0.0, -1e9).astype(jnp.float32)    # (B, S)
    key_bias = pad.reshape(1, N)                                # per merged key col
    batch_of = jnp.repeat(jnp.arange(B), S)                     # (N,)
    same = batch_of[:, None] == batch_of[None, :]               # (N, N)
    return jnp.where(same, key_bias, jnp.float32(-1e9))         # (N, N)


@jax.jit
def encoder_layer(x, mask, w_slab, vec_slab):
    """x: (B,S,D) f32, mask: (B,S) 1/0, slabs: prebuilt by _pack_params."""
    x_flat = x.reshape(N, D)
    bias = _attn_bias(mask)                                     # (N, N)
    bias_rows = jnp.zeros((N, D), jnp.float32).at[:, 0:N].set(bias)
    xa = jnp.concatenate([x_flat, bias_rows], axis=0)           # (2N, D) one slab

    vmem = pl.BlockSpec(memory_space=pltpu.MemorySpace.VMEM)    # whole array in VMEM
    out = pl.pallas_call(
        encoder_layer_kernel,
        out_shape=jax.ShapeDtypeStruct((N, D), jnp.float32),
        in_specs=[vmem, vmem, vmem],
        out_specs=vmem,
    )(xa, w_slab, vec_slab)
    return out.reshape(B, S, D)


# ---------------------------------------------------------------------------
# Pure-JAX reference for verification.
# ---------------------------------------------------------------------------
def reference(x, mask, params):
    (wq, bq, wk, bk, wv, bv, wo, bo,
     w1, b1, w2, b2, ln1g, ln1b, ln2g, ln2b) = params

    def ln(z, g, bta):
        mean = jnp.mean(z, axis=-1, keepdims=True)
        std = jnp.sqrt(jnp.sum((z - mean) ** 2, axis=-1, keepdims=True) / (D - 1))
        return g * (z - mean) / (std + EPS) + bta

    n1 = ln(x, ln1g[0], ln1b[0])
    q = n1 @ wq + bq[0]
    k = n1 @ wk + bk[0]
    v = n1 @ wv + bv[0]
    q = q.reshape(B, S, H, DK).transpose(0, 2, 1, 3)
    k = k.reshape(B, S, H, DK).transpose(0, 2, 1, 3)
    v = v.reshape(B, S, H, DK).transpose(0, 2, 1, 3)
    scores = jnp.einsum("bhqd,bhkd->bhqk", q, k) / jnp.sqrt(jnp.float32(DK))
    scores = jnp.where(mask[:, None, None, :] > 0, scores, -1e9)
    p = jax.nn.softmax(scores, axis=-1)
    attn = jnp.einsum("bhqk,bhkd->bhqd", p, v).transpose(0, 2, 1, 3).reshape(B, S, D)
    x1 = x + (attn @ wo + bo[0])
    n2 = ln(x1, ln2g[0], ln2b[0])
    ff = jnp.maximum(n2 @ w1 + b1[0], 0.0) @ w2 + b2[0]
    return x1 + ff


def make_params(key):
    ks = jax.random.split(key, 8)
    init = lambda k, shape: (0.02 * jax.random.normal(k, shape)).astype(jnp.float32)
    wq = init(ks[0], (D, D)); wk = init(ks[1], (D, D))
    wv = init(ks[2], (D, D)); wo = init(ks[3], (D, D))
    w1 = init(ks[4], (D, F)); w2 = init(ks[5], (F, D))
    zeros = lambda n: jnp.zeros((1, n), jnp.float32)
    ones = lambda n: jnp.ones((1, n), jnp.float32)
    return (wq, zeros(D), wk, zeros(D), wv, zeros(D), wo, zeros(D),
            w1, zeros(F), w2, zeros(D),
            ones(D), zeros(D), ones(D), zeros(D))


if __name__ == "__main__":
    key = jax.random.PRNGKey(0)
    kx, km, kp = jax.random.split(key, 3)

    x = jax.random.normal(kx, (B, S, D), dtype=jnp.float32)
    # padding mask: last 2 key positions of batch element 1 are masked out
    mask = jnp.ones((B, S), jnp.float32).at[1, -2:].set(0.0)
    params = make_params(kp)

    # Parameter slabs are packed ONCE at load time (hoisted off the call path).
    w_slab, vec_slab = _pack_params(params)
    w_slab = jax.block_until_ready(w_slab)
    vec_slab = jax.block_until_ready(vec_slab)

    out = jax.block_until_ready(encoder_layer(x, mask, w_slab, vec_slab))
    ref = reference(x, mask, params)

    assert out.shape == (B, S, D)
    assert jnp.allclose(out, ref, atol=1e-4, rtol=1e-4), (
        f"max abs err = {jnp.max(jnp.abs(out - ref))}")
    print("KERNEL_OK")
</pallas_src>

<mosaic_0001>
module attributes {stable_mosaic.version = 11 : i64} {
  func.func @encoder_layer_kernel(%arg0: memref<32x32xf32, #tpu.memory_space<vmem>>, %arg1: memref<160x96xf32, #tpu.memory_space<vmem>>, %arg2: memref<8x128xf32, #tpu.memory_space<vmem>>, %arg3: memref<16x32xf32, #tpu.memory_space<vmem>>) attributes {dimension_semantics = [], scalar_prefetch = 0 : i64, scratch_operands = 0 : i64, tpu.core_type = #tpu.core_type<tc>} {
    %c0 = arith.constant 0 : index
    %c0_0 = arith.constant 0 : index
    %0 = vector.load %arg0[%c0, %c0_0] : memref<32x32xf32, #tpu.memory_space<vmem>>, vector<16x32xf32>
    %c16 = arith.constant 16 : index
    %c0_1 = arith.constant 0 : index
    %1 = vector.load %arg0[%c16, %c0_1] : memref<32x32xf32, #tpu.memory_space<vmem>>, vector<16x16xf32>
    %c0_2 = arith.constant 0 : index
    %c0_3 = arith.constant 0 : index
    %2 = vector.load %arg1[%c0_2, %c0_3] : memref<160x96xf32, #tpu.memory_space<vmem>>, vector<32x96xf32>
    %c64 = arith.constant 64 : index
    %c0_4 = arith.constant 0 : index
    %3 = vector.load %arg1[%c64, %c0_4] : memref<160x96xf32, #tpu.memory_space<vmem>>, vector<32x64xf32>
    %c96 = arith.constant 96 : index
    %c0_5 = arith.constant 0 : index
    %4 = vector.load %arg1[%c96, %c0_5] : memref<160x96xf32, #tpu.memory_space<vmem>>, vector<64x32xf32>
    %c0_6 = arith.constant 0 : index
    %c0_7 = arith.constant 0 : index
    %5 = vector.load %arg2[%c0_6, %c0_7] : memref<8x128xf32, #tpu.memory_space<vmem>>, vector<1x96xf32>
    %c1 = arith.constant 1 : index
    %c0_8 = arith.constant 0 : index
    %6 = vector.load %arg2[%c1, %c0_8] : memref<8x128xf32, #tpu.memory_space<vmem>>, vector<1x32xf32>
    %c2 = arith.constant 2 : index
    %c0_9 = arith.constant 0 : index
    %7 = vector.load %arg2[%c2, %c0_9] : memref<8x128xf32, #tpu.memory_space<vmem>>, vector<1x64xf32>
    %c3 = arith.constant 3 : index
    %c0_10 = arith.constant 0 : index
    %8 = vector.load %arg2[%c3, %c0_10] : memref<8x128xf32, #tpu.memory_space<vmem>>, vector<1x32xf32>
    %c4 = arith.constant 4 : index
    %c0_11 = arith.constant 0 : index
    %9 = vector.load %arg2[%c4, %c0_11] : memref<8x128xf32, #tpu.memory_space<vmem>>, vector<1x32xf32>
    %c5 = arith.constant 5 : index
    %c0_12 = arith.constant 0 : index
    %10 = vector.load %arg2[%c5, %c0_12] : memref<8x128xf32, #tpu.memory_space<vmem>>, vector<1x32xf32>
    %c6 = arith.constant 6 : index
    %c0_13 = arith.constant 0 : index
    %11 = vector.load %arg2[%c6, %c0_13] : memref<8x128xf32, #tpu.memory_space<vmem>>, vector<1x32xf32>
    %c7 = arith.constant 7 : index
    %c0_14 = arith.constant 0 : index
    %12 = vector.load %arg2[%c7, %c0_14] : memref<8x128xf32, #tpu.memory_space<vmem>>, vector<1x32xf32>
    %cst = arith.constant dense<0.000000e+00> : vector<16xf32>
    %13 = vector.multi_reduction <add>, %0, %cst [1] : vector<16x32xf32> to vector<16xf32>
    %14 = vector.shape_cast %13 : vector<16xf32> to vector<16x1xf32>
    %15 = arith.mulf %0, %0 : vector<16x32xf32>
    %cst_15 = arith.constant dense<0.000000e+00> : vector<16xf32>
    %16 = vector.multi_reduction <add>, %15, %cst_15 [1] : vector<16x32xf32> to vector<16xf32>
    %17 = vector.shape_cast %16 : vector<16xf32> to vector<16x1xf32>
    %cst_16 = arith.constant 3.125000e-02 : f32
    %18 = vector.broadcast %cst_16 : f32 to vector<16x1xf32>
    %19 = arith.mulf %14, %18 : vector<16x1xf32>
    %20 = arith.mulf %19, %14 : vector<16x1xf32>
    %21 = arith.subf %17, %20 : vector<16x1xf32>
    %cst_17 = arith.constant 0.000000e+00 : f32
    %22 = vector.broadcast %cst_17 : f32 to vector<16x1xf32>
    %23 = arith.maximumf %21, %22 : vector<16x1xf32>
    %cst_18 = arith.constant 0.0322580636 : f32
    %24 = vector.broadcast %cst_18 : f32 to vector<16x1xf32>
    %25 = arith.mulf %23, %24 : vector<16x1xf32>
    %26 = math.sqrt %25 : vector<16x1xf32>
    %cst_19 = arith.constant 9.99999997E-7 : f32
    %27 = vector.broadcast %cst_19 : f32 to vector<16x1xf32>
    %28 = arith.addf %26, %27 : vector<16x1xf32>
    %29 = tpu.reciprocal %28 {approx = true} : vector<16x1xf32> -> vector<16x1xf32>
    %30 = vector.broadcast %19 : vector<16x1xf32> to vector<16x32xf32>
    %31 = arith.subf %0, %30 : vector<16x32xf32>
    %32 = vector.broadcast %29 : vector<16x1xf32> to vector<16x32xf32>
    %33 = arith.mulf %31, %32 : vector<16x32xf32>
    %34 = vector.broadcast %9 : vector<1x32xf32> to vector<16x32xf32>
    %35 = arith.mulf %34, %33 : vector<16x32xf32>
    %36 = vector.broadcast %10 : vector<1x32xf32> to vector<16x32xf32>
    %37 = arith.addf %35, %36 : vector<16x32xf32>
    %cst_20 = arith.constant dense<0.000000e+00> : vector<16x96xf32>
    %38 = tpu.matmul %37, %2, %cst_20 {dimension_numbers = #tpu.dot_dimension_numbers<[1], [0], [0], [1], [0, 0, 1, 1], [], []>} : vector<16x32xf32>, vector<32x96xf32>, vector<16x96xf32> -> vector<16x96xf32>
    %39 = vector.broadcast %5 : vector<1x96xf32> to vector<16x96xf32>
    %40 = arith.addf %38, %39 : vector<16x96xf32>
    %41 = vector.extract_strided_slice %40 {offsets = [0, 0], sizes = [16, 8], strides = [1, 1]} : vector<16x96xf32> to vector<16x8xf32>
    %42 = vector.extract_strided_slice %40 {offsets = [0, 32], sizes = [16, 8], strides = [1, 1]} : vector<16x96xf32> to vector<16x8xf32>
    %43 = vector.extract_strided_slice %40 {offsets = [0, 64], sizes = [16, 8], strides = [1, 1]} : vector<16x96xf32> to vector<16x8xf32>
    %cst_21 = arith.constant dense<0.000000e+00> : vector<16x16xf32>
    %44 = tpu.matmul %41, %42, %cst_21 {dimension_numbers = #tpu.dot_dimension_numbers<[1], [1], [0], [0], [0, 0, 1, 0], [], []>} : vector<16x8xf32>, vector<16x8xf32>, vector<16x16xf32> -> vector<16x16xf32>
    %45 = arith.addf %44, %1 : vector<16x16xf32>
    %cst_22 = arith.constant dense<0xFF800000> : vector<16xf32>
    %46 = vector.multi_reduction <maximumf>, %45, %cst_22 [1] : vector<16x16xf32> to vector<16xf32>
    %47 = vector.shape_cast %46 : vector<16xf32> to vector<16x1xf32>
    %48 = vector.broadcast %47 : vector<16x1xf32> to vector<16x16xf32>
    %49 = arith.subf %45, %48 : vector<16x16xf32>
    %50 = math.exp %49 : vector<16x16xf32>
    %cst_23 = arith.constant dense<0.000000e+00> : vector<16xf32>
    %51 = vector.multi_reduction <add>, %50, %cst_23 [1] : vector<16x16xf32> to vector<16xf32>
    %52 = vector.shape_cast %51 : vector<16xf32> to vector<16x1xf32>
    %53 = tpu.reciprocal %52 {approx = true} : vector<16x1xf32> -> vector<16x1xf32>
    %54 = vector.broadcast %53 : vector<16x1xf32> to vector<16x16xf32>
    %55 = arith.mulf %50, %54 : vector<16x16xf32>
    %cst_24 = arith.constant dense<0.000000e+00> : vector<16x8xf32>
    %56 = tpu.matmul %55, %43, %cst_24 {dimension_numbers = #tpu.dot_dimension_numbers<[1], [0], [0], [1], [0, 0, 1, 1], [], []>} : vector<16x16xf32>, vector<16x8xf32>, vector<16x8xf32> -> vector<16x8xf32>
    %c32 = arith.constant 32 : index
    %c0_25 = arith.constant 0 : index
    %57 = vector.load %arg1[%c32, %c0_25] : memref<160x96xf32, #tpu.memory_space<vmem>>, vector<8x32xf32>
    %cst_26 = arith.constant dense<0.000000e+00> : vector<16x32xf32>
    %58 = tpu.matmul %56, %57, %cst_26 {dimension_numbers = #tpu.dot_dimension_numbers<[1], [0], [0], [1], [0, 0, 1, 1], [], []>} : vector<16x8xf32>, vector<8x32xf32>, vector<16x32xf32> -> vector<16x32xf32>
    %59 = vector.extract_strided_slice %40 {offsets = [0, 8], sizes = [16, 8], strides = [1, 1]} : vector<16x96xf32> to vector<16x8xf32>
    %60 = vector.extract_strided_slice %40 {offsets = [0, 40], sizes = [16, 8], strides = [1, 1]} : vector<16x96xf32> to vector<16x8xf32>
    %61 = vector.extract_strided_slice %40 {offsets = [0, 72], sizes = [16, 8], strides = [1, 1]} : vector<16x96xf32> to vector<16x8xf32>
    %cst_27 = arith.constant dense<0.000000e+00> : vector<16x16xf32>
    %62 = tpu.matmul %59, %60, %cst_27 {dimension_numbers = #tpu.dot_dimension_numbers<[1], [1], [0], [0], [0, 0, 1, 0], [], []>} : vector<16x8xf32>, vector<16x8xf32>, vector<16x16xf32> -> vector<16x16xf32>
    %63 = arith.addf %62, %1 : vector<16x16xf32>
    %cst_28 = arith.constant dense<0xFF800000> : vector<16xf32>
    %64 = vector.multi_reduction <maximumf>, %63, %cst_28 [1] : vector<16x16xf32> to vector<16xf32>
    %65 = vector.shape_cast %64 : vector<16xf32> to vector<16x1xf32>
    %66 = vector.broadcast %65 : vector<16x1xf32> to vector<16x16xf32>
    %67 = arith.subf %63, %66 : vector<16x16xf32>
    %68 = math.exp %67 : vector<16x16xf32>
    %cst_29 = arith.constant dense<0.000000e+00> : vector<16xf32>
    %69 = vector.multi_reduction <add>, %68, %cst_29 [1] : vector<16x16xf32> to vector<16xf32>
    %70 = vector.shape_cast %69 : vector<16xf32> to vector<16x1xf32>
    %71 = tpu.reciprocal %70 {approx = true} : vector<16x1xf32> -> vector<16x1xf32>
    %72 = vector.broadcast %71 : vector<16x1xf32> to vector<16x16xf32>
    %73 = arith.mulf %68, %72 : vector<16x16xf32>
    %cst_30 = arith.constant dense<0.000000e+00> : vector<16x8xf32>
    %74 = tpu.matmul %73, %61, %cst_30 {dimension_numbers = #tpu.dot_dimension_numbers<[1], [0], [0], [1], [0, 0, 1, 1], [], []>} : vector<16x16xf32>, vector<16x8xf32>, vector<16x8xf32> -> vector<16x8xf32>
    %c40 = arith.constant 40 : index
    %c0_31 = arith.constant 0 : index
    %75 = vector.load %arg1[%c40, %c0_31] : memref<160x96xf32, #tpu.memory_space<vmem>>, vector<8x32xf32>
    %cst_32 = arith.constant dense<0.000000e+00> : vector<16x32xf32>
    %76 = tpu.matmul %74, %75, %cst_32 {dimension_numbers = #tpu.dot_dimension_numbers<[1], [0], [0], [1], [0, 0, 1, 1], [], []>} : vector<16x8xf32>, vector<8x32xf32>, vector<16x32xf32> -> vector<16x32xf32>
    %77 = arith.addf %58, %76 : vector<16x32xf32>
    %78 = vector.extract_strided_slice %40 {offsets = [0, 16], sizes = [16, 8], strides = [1, 1]} : vector<16x96xf32> to vector<16x8xf32>
    %79 = vector.extract_strided_slice %40 {offsets = [0, 48], sizes = [16, 8], strides = [1, 1]} : vector<16x96xf32> to vector<16x8xf32>
    %80 = vector.extract_strided_slice %40 {offsets = [0, 80], sizes = [16, 8], strides = [1, 1]} : vector<16x96xf32> to vector<16x8xf32>
    %cst_33 = arith.constant dense<0.000000e+00> : vector<16x16xf32>
    %81 = tpu.matmul %78, %79, %cst_33 {dimension_numbers = #tpu.dot_dimension_numbers<[1], [1], [0], [0], [0, 0, 1, 0], [], []>} : vector<16x8xf32>, vector<16x8xf32>, vector<16x16xf32> -> vector<16x16xf32>
    %82 = arith.addf %81, %1 : vector<16x16xf32>
    %cst_34 = arith.constant dense<0xFF800000> : vector<16xf32>
    %83 = vector.multi_reduction <maximumf>, %82, %cst_34 [1] : vector<16x16xf32> to vector<16xf32>
    %84 = vector.shape_cast %83 : vector<16xf32> to vector<16x1xf32>
    %85 = vector.broadcast %84 : vector<16x1xf32> to vector<16x16xf32>
    %86 = arith.subf %82, %85 : vector<16x16xf32>
    %87 = math.exp %86 : vector<16x16xf32>
    %cst_35 = arith.constant dense<0.000000e+00> : vector<16xf32>
    %88 = vector.multi_reduction <add>, %87, %cst_35 [1] : vector<16x16xf32> to vector<16xf32>
    %89 = vector.shape_cast %88 : vector<16xf32> to vector<16x1xf32>
    %90 = tpu.reciprocal %89 {approx = true} : vector<16x1xf32> -> vector<16x1xf32>
    %91 = vector.broadcast %90 : vector<16x1xf32> to vector<16x16xf32>
    %92 = arith.mulf %87, %91 : vector<16x16xf32>
    %cst_36 = arith.constant dense<0.000000e+00> : vector<16x8xf32>
    %93 = tpu.matmul %92, %80, %cst_36 {dimension_numbers = #tpu.dot_dimension_numbers<[1], [0], [0], [1], [0, 0, 1, 1], [], []>} : vector<16x16xf32>, vector<16x8xf32>, vector<16x8xf32> -> vector<16x8xf32>
    %c48 = arith.constant 48 : index
    %c0_37 = arith.constant 0 : index
    %94 = vector.load %arg1[%c48, %c0_37] : memref<160x96xf32, #tpu.memory_space<vmem>>, vector<8x32xf32>
    %cst_38 = arith.constant dense<0.000000e+00> : vector<16x32xf32>
    %95 = tpu.matmul %93, %94, %cst_38 {dimension_numbers = #tpu.dot_dimension_numbers<[1], [0], [0], [1], [0, 0, 1, 1], [], []>} : vector<16x8xf32>, vector<8x32xf32>, vector<16x32xf32> -> vector<16x32xf32>
    %96 = arith.addf %77, %95 : vector<16x32xf32>
    %97 = vector.extract_strided_slice %40 {offsets = [0, 24], sizes = [16, 8], strides = [1, 1]} : vector<16x96xf32> to vector<16x8xf32>
    %98 = vector.extract_strided_slice %40 {offsets = [0, 56], sizes = [16, 8], strides = [1, 1]} : vector<16x96xf32> to vector<16x8xf32>
    %99 = vector.extract_strided_slice %40 {offsets = [0, 88], sizes = [16, 8], strides = [1, 1]} : vector<16x96xf32> to vector<16x8xf32>
    %cst_39 = arith.constant dense<0.000000e+00> : vector<16x16xf32>
    %100 = tpu.matmul %97, %98, %cst_39 {dimension_numbers = #tpu.dot_dimension_numbers<[1], [1], [0], [0], [0, 0, 1, 0], [], []>} : vector<16x8xf32>, vector<16x8xf32>, vector<16x16xf32> -> vector<16x16xf32>
    %101 = arith.addf %100, %1 : vector<16x16xf32>
    %cst_40 = arith.constant dense<0xFF800000> : vector<16xf32>
    %102 = vector.multi_reduction <maximumf>, %101, %cst_40 [1] : vector<16x16xf32> to vector<16xf32>
    %103 = vector.shape_cast %102 : vector<16xf32> to vector<16x1xf32>
    %104 = vector.broadcast %103 : vector<16x1xf32> to vector<16x16xf32>
    %105 = arith.subf %101, %104 : vector<16x16xf32>
    %106 = math.exp %105 : vector<16x16xf32>
    %cst_41 = arith.constant dense<0.000000e+00> : vector<16xf32>
    %107 = vector.multi_reduction <add>, %106, %cst_41 [1] : vector<16x16xf32> to vector<16xf32>
    %108 = vector.shape_cast %107 : vector<16xf32> to vector<16x1xf32>
    %109 = tpu.reciprocal %108 {approx = true} : vector<16x1xf32> -> vector<16x1xf32>
    %110 = vector.broadcast %109 : vector<16x1xf32> to vector<16x16xf32>
    %111 = arith.mulf %106, %110 : vector<16x16xf32>
    %cst_42 = arith.constant dense<0.000000e+00> : vector<16x8xf32>
    %112 = tpu.matmul %111, %99, %cst_42 {dimension_numbers = #tpu.dot_dimension_numbers<[1], [0], [0], [1], [0, 0, 1, 1], [], []>} : vector<16x16xf32>, vector<16x8xf32>, vector<16x8xf32> -> vector<16x8xf32>
    %c56 = arith.constant 56 : index
    %c0_43 = arith.constant 0 : index
    %113 = vector.load %arg1[%c56, %c0_43] : memref<160x96xf32, #tpu.memory_space<vmem>>, vector<8x32xf32>
    %cst_44 = arith.constant dense<0.000000e+00> : vector<16x32xf32>
    %114 = tpu.matmul %112, %113, %cst_44 {dimension_numbers = #tpu.dot_dimension_numbers<[1], [0], [0], [1], [0, 0, 1, 1], [], []>} : vector<16x8xf32>, vector<8x32xf32>, vector<16x32xf32> -> vector<16x32xf32>
    %115 = arith.addf %96, %114 : vector<16x32xf32>
    %116 = arith.addf %0, %115 : vector<16x32xf32>
    %117 = vector.broadcast %6 : vector<1x32xf32> to vector<16x32xf32>
    %118 = arith.addf %116, %117 : vector<16x32xf32>
    %cst_45 = arith.constant dense<0.000000e+00> : vector<16xf32>
    %119 = vector.multi_reduction <add>, %118, %cst_45 [1] : vector<16x32xf32> to vector<16xf32>
    %120 = vector.shape_cast %119 : vector<16xf32> to vector<16x1xf32>
    %121 = arith.mulf %118, %118 : vector<16x32xf32>
    %cst_46 = arith.constant dense<0.000000e+00> : vector<16xf32>
    %122 = vector.multi_reduction <add>, %121, %cst_46 [1] : vector<16x32xf32> to vector<16xf32>
    %123 = vector.shape_cast %122 : vector<16xf32> to vector<16x1xf32>
    %cst_47 = arith.constant 3.125000e-02 : f32
    %124 = vector.broadcast %cst_47 : f32 to vector<16x1xf32>
    %125 = arith.mulf %120, %124 : vector<16x1xf32>
    %126 = arith.mulf %125, %120 : vector<16x1xf32>
    %127 = arith.subf %123, %126 : vector<16x1xf32>
    %cst_48 = arith.constant 0.000000e+00 : f32
    %128 = vector.broadcast %cst_48 : f32 to vector<16x1xf32>
    %129 = arith.maximumf %127, %128 : vector<16x1xf32>
    %cst_49 = arith.constant 0.0322580636 : f32
    %130 = vector.broadcast %cst_49 : f32 to vector<16x1xf32>
    %131 = arith.mulf %129, %130 : vector<16x1xf32>
    %132 = math.sqrt %131 : vector<16x1xf32>
    %cst_50 = arith.constant 9.99999997E-7 : f32
    %133 = vector.broadcast %cst_50 : f32 to vector<16x1xf32>
    %134 = arith.addf %132, %133 : vector<16x1xf32>
    %135 = tpu.reciprocal %134 {approx = true} : vector<16x1xf32> -> vector<16x1xf32>
    %136 = vector.broadcast %125 : vector<16x1xf32> to vector<16x32xf32>
    %137 = arith.subf %118, %136 : vector<16x32xf32>
    %138 = vector.broadcast %135 : vector<16x1xf32> to vector<16x32xf32>
    %139 = arith.mulf %137, %138 : vector<16x32xf32>
    %140 = vector.broadcast %11 : vector<1x32xf32> to vector<16x32xf32>
    %141 = arith.mulf %140, %139 : vector<16x32xf32>
    %142 = vector.broadcast %12 : vector<1x32xf32> to vector<16x32xf32>
    %143 = arith.addf %141, %142 : vector<16x32xf32>
    %cst_51 = arith.constant dense<0.000000e+00> : vector<16x64xf32>
    %144 = tpu.matmul %143, %3, %cst_51 {dimension_numbers = #tpu.dot_dimension_numbers<[1], [0], [0], [1], [0, 0, 1, 1], [], []>} : vector<16x32xf32>, vector<32x64xf32>, vector<16x64xf32> -> vector<16x64xf32>
    %145 = vector.broadcast %7 : vector<1x64xf32> to vector<16x64xf32>
    %146 = arith.addf %144, %145 : vector<16x64xf32>
    %cst_52 = arith.constant 0.000000e+00 : f32
    %147 = vector.broadcast %cst_52 : f32 to vector<16x64xf32>
    %148 = arith.maximumf %146, %147 : vector<16x64xf32>
    %cst_53 = arith.constant dense<0.000000e+00> : vector<16x32xf32>
    %149 = tpu.matmul %148, %4, %cst_53 {dimension_numbers = #tpu.dot_dimension_numbers<[1], [0], [0], [1], [0, 0, 1, 1], [], []>} : vector<16x64xf32>, vector<64x32xf32>, vector<16x32xf32> -> vector<16x32xf32>
    %150 = vector.broadcast %8 : vector<1x32xf32> to vector<16x32xf32>
    %151 = arith.addf %149, %150 : vector<16x32xf32>
    %152 = arith.addf %118, %151 : vector<16x32xf32>
    %c0_54 = arith.constant 0 : index
    %c0_55 = arith.constant 0 : index
    %153 = vector.load %arg3[%c0_54, %c0_55] : memref<16x32xf32, #tpu.memory_space<vmem>>, vector<16x32xf32>
    tpu.vector_store %arg3[%c0_54, %c0_55], %152 {strides = array<i32>} : memref<16x32xf32, #tpu.memory_space<vmem>>, vector<16x32xf32>,
    return
  }
}

</mosaic_0001>

<bundles_post_ra>
// kernel: eq.8
= control target key start
LH: loop header
LB: loop body
LE: loop exit
PB: predicated region body
PF: predicated region fallthrough
CT: control target
= control target key end

     0   :  { %vm7_vm0 = vcmask 64512   ;;  %vm13_vm1 = vcmask 130112   ;;  %s39_s0 = inlined_call_operand.vmem [shape: s32[2,8], index: 0, kind: input, shape index: {}]   ;;  %s40_s1 = inlined_call_operand.vmem [shape: s32[16], index: 1, kind: output, shape index: {}]  }
   0x1   :  { %v4_v0 = vld [vmem:[%s39_s0] sm:$0x3]  ;;  %s22_s0 = smov 8  }
   0x2   :  { %5 = vst [vmem:[#allocation1] sm:$0x3] %v4_v0 }
   0x9   :  { %v10_v1 = vld [vmem:[#allocation1 + $0x1] sm:$0x1]   ;;  %v6_v2 = vld [vmem:[#allocation1] sm:$0x1]  }
   0xa   :  { %11 = vrot.lane.b32.xlu0 %v10_v1, %s22_s0  ;;  %8 = vst.msk [vmem:[#allocation0] sm:$0x1] %vm7_vm0, %v6_v2  }
  0x7c   :  { %v12_v3 = vpop.permute.xlu0 %11  }
  0x7d   :  { %14 = vst.msk [vmem:[#allocation0] sm:$0x1] %vm13_vm1, %v12_v3  }
  0x84   :  { %v17_v4 = vld [vmem:[#allocation0] sm:$0x1] }
  0x85   :  { %20 = vst [vmem:[%s40_s1] sm:$0x1] %v17_v4 }

// kernel: encoder_layer.1
= control target key start
LH: loop header
LB: loop body
LE: loop exit
PB: predicated region body
PF: predicated region fallthrough
CT: control target
= control target key end

     0   :  { %8 = vsyncpa [#allocation3], 0  ;;  %s1221_s0 = inlined_call_operand.vmem [shape: f32[32,32], index: 0, kind: input, shape index: {}]   ;;  %s1222_s1 = inlined_call_operand.hbm [shape: f32[160,96], index: 1, kind: input, shape index: {}]   ;;  %s1223_s2 = inlined_call_operand.vmem [shape: f32[8,128], index: 2, kind: input, shape index: {}]   ;;  %s1224_s3 = inlined_call_operand.hbm [shape: f32[16,32], index: 3, kind: output, shape index: {}]  }
   0x1   :  { %9 = vsyncpa [#allocation4], 0  ;;  %s16_s14 = sshll.u32 %s1222_s1, 4  ;;  %s998_s15 = smov [#allocation2]   ;;  %s17_s14 = int_to_ptr.hbm [resolvable:$true] %s16_s14 }
   0x2   :  { %s18_s16 = sshll.u32 %s998_s15, 4  ;;  %s999_s17 = smov 128   ;;  %s19_s16 = int_to_ptr.vmem [resolvable:$true] %s18_s16 }
   0x3   :  { %s1000_s18 = smov 8  }
   0x4   :  { %24 = dma.hbm_to_vmem [thread:$0]  %s17_s14, 2560, %s19_s16, [#allocation3], %s999_s17, %s999_s17, %s1000_s18  }
   0x5   :  { %994 = dma.done.wait [#allocation3], 2560  }
   0x6   :  { %995 = vsyncadd [#allocation3], 4294964736  ;;  %vm59_vm0 = vcmask 261120   ;;  %v1042_v0 = vld [vmem:[%s1221_s0 + $0x8] sm:$0xff]  ;;  %v1047_v1 = vld [vmem:[%s1221_s0] sm:$0xff]  ;;  %s1001_s28 = smov 96  }
   0x7   :  { %v63_v2 = vsel %vm59_vm0, %v1042_v0, 0.0  ;;  %v60_v3 = vsel %vm59_vm0, %v1047_v1, 0.0  ;;  %v67_v4 = vmul.f32 %v1042_v0, %v1042_v0  ;;  %v66_v5 = vmul.f32 %v1047_v1, %v1047_v1  ;;  %v38_v8 = vld [vmem:[#allocation2 + $0x18] sm:$0xff]  ;;  %v37_v9 = vld [vmem:[#allocation2 + $0x10] sm:$0xff]  ;;  %v36_v10 = vld [vmem:[#allocation2 + $0x8] sm:$0xff]  ;;  %s1002_s6 = smov 64  }
   0x8   :  { %64 = vadd.xlane.f32.xlu0 %v63_v2  ;;  %61 = vadd.xlane.f32.xlu1 %v60_v3  ;;  %v35_v11 = vld [vmem:[#allocation2] sm:$0xff]  ;;  %vm158_vm5 = vcmask 64512   ;;  %vm190_vm6 = vcmask 130048   ;;  %s1003_s7 = smov 88   ;;  %s1004_s8 = smov 120   ;;  %vm760_vm11 = vcmask 523264  }
   0x9   :  { %v71_v6 = vsel %vm59_vm0, %v67_v4, 0.0  ;;  %v68_v7 = vsel %vm59_vm0, %v66_v5, 0.0  ;;  %141 = vmatpush.msra.mxu0 %v38_v8  ;;  %851 = vmatpush.msra.mxu3 %v38_v8  ;;  %v890_v49 = vld [vmem:[%s1223_s2 + $0x4] ss:$0 sm:$0xff]  ;;  %v891_v53 = vld [vmem:[%s1223_s2 + $0x5] ss:$0 sm:$0xff] }
   0xa   :  { %v892_v60 = vld [vmem:[%s1223_s2] ss:$0 sm:$0xff]  ;;  %v1087_v5 = vld [vmem:[%s1221_s0 + $0x10] sm:$0xff]  ;;  %s1006_s9 = smov 104   ;;  %s1007_s10 = smov 80  }
   0xb   :  { %142 = vmatpush.msra.mxu0 %v37_v9  ;;  %852 = vmatpush.msra.mxu3 %v37_v9  ;;  %v1094_v9 = vld [vmem:[%s1221_s0 + $0x18] sm:$0xff]  ;;  %s1005_s0 = smov 72   ;;  %s1008_s11 = smov 112  }
   0xc   :  { %s1009_s12 = smov 56   ;;  %s1010_s13 = smov 48  }
   0xd   :  { %143 = vmatpush.msra.mxu0 %v36_v10  ;;  %853 = vmatpush.msra.mxu3 %v36_v10  ;;  %s1011_s14 = smov 40   ;;  %s1012_s26 = smov [#allocation5]  }
   0xe   :  { %s798_s27 = sshll.u32 %s1012_s26, 4  ;;  %s800_s30 = sshll.u32 %s1224_s3, 4  ;;  %s799_s27 = int_to_ptr.vmem [resolvable:$true] %s798_s27  ;;  %s801_s30 = int_to_ptr.hbm [resolvable:$true] %s800_s30 }
   0xf   :  { %144 = vmatpush.msra.mxu0 %v35_v11  ;;  %854 = vmatpush.msra.mxu3 %v35_v11 }
  0x10   :  { %72 = vadd.xlane.f32.xlu0 %v71_v6  ;;  %69 = vadd.xlane.f32.xlu1 %v68_v7 }
  0x7b   :  { %v65_v12 = vpop.xlane.xlu0 %64  ;;  %v62_v13 = vpop.xlane.xlu1 %61 }
  0x7c   :  { %v74_v14 = vmul.f32 0.03125, %v62_v13  ;;  %v75_v15 = vmul.f32 0.03125, %v65_v12 }
  0x7e   :  { %v76_v16 = vmul.f32 %v74_v14, %v62_v13  ;;  %v77_v17 = vmul.f32 %v75_v15, %v65_v12  ;;  %v113_v48 = vsub.f32 %v1042_v0, %v75_v15  ;;  %v112_v51 = vsub.f32 %v1047_v1, %v74_v14 }
  0x83   :  { %v73_v18 = vpop.xlane.xlu0 %72  ;;  %v70_v19 = vpop.xlane.xlu1 %69 }
  0x84   :  { %v79_v20 = vsub.f32 %v73_v18, %v77_v17  ;;  %v78_v21 = vsub.f32 %v70_v19, %v76_v16  ;;  %v248_v17 = vld [vmem:[#allocation2 + $0x20] sm:$0xff] }
  0x86   :  { %v81_v22 = vmax.f32 %v79_v20, 0.0  ;;  %v80_v23 = vmax.f32 %v78_v21, 0.0 }
  0x88   :  { %v83_v24 = vmul.f32 0.032258064, %v81_v22  ;;  %v82_v25 = vmul.f32 0.032258064, %v80_v23 }
  0x8a   :  { %898 = vrsqrt.f32 %v83_v24  ;;  %vm103_vm1 = vcmp.eq.f32.partialorder %v83_v24, inf  ;;  %v106_v40 = vand.u32 2147483648, %v83_v24  ;;  %vm91_vm2 = vcmp.eq.f32.partialorder %v82_v25, inf }
  0x8b   :  { %900 = vrsqrt.f32 %v82_v25  ;;  %v94_v41 = vand.u32 2147483648, %v82_v25  ;;  %vm105_vm3 = vcmp.eq.f32.partialorder %v83_v24, 0.0  ;;  %vm93_vm4 = vcmp.eq.f32.partialorder %v82_v25, 0.0 }
  0x90   :  { %v899_v26 = vpop.eup %898 }
  0x91   :  { %v901_v27 = vpop.eup %900  ;;  %v97_v28 = vmul.f32 %v899_v26, %v83_v24 }
  0x92   :  { %v85_v29 = vmul.f32 %v901_v27, %v82_v25 }
  0x93   :  { %v98_v30 = vmul.f32 %v899_v26, %v97_v28 }
  0x94   :  { %v86_v31 = vmul.f32 %v901_v27, %v85_v29 }
  0x95   :  { %v99_v32 = vmul.f32 0.5, %v98_v30 }
  0x96   :  { %v87_v33 = vmul.f32 0.5, %v86_v31 }
  0x97   :  { %v100_v34 = vsub.f32 1.5, %v99_v32 }
  0x98   :  { %v88_v35 = vsub.f32 1.5, %v87_v33 }
  0x99   :  { %v101_v36 = vmul.f32 %v899_v26, %v100_v34 }
  0x9a   :  { %v89_v37 = vmul.f32 %v901_v27, %v88_v35 }
  0x9b   :  { %v102_v38 = vmul.f32 %v101_v36, %v83_v24 }
  0x9c   :  { %v90_v39 = vmul.f32 %v89_v37, %v82_v25 }
  0x9d   :  { %v104_v42 = vsel %vm103_vm1, %v83_v24, %v102_v38 }
  0x9e   :  { %v92_v43 = vsel %vm91_vm2, %v82_v25, %v90_v39  ;;  %v107_v44 = vsel %vm105_vm3, %v106_v40, %v104_v42 }
  0x9f   :  { %v95_v45 = vsel %vm93_vm4, %v94_v41, %v92_v43  ;;  %v109_v46 = vadd.f32 1e-06, %v107_v44 }
  0xa0   :  { %v108_v47 = vadd.f32 1e-06, %v95_v45 }
  0xa1   :  { %902 = vrcp.f32 %v109_v46 }
  0xa2   :  { %904 = vrcp.f32 %v108_v47 }
  0xa7   :  { %v903_v50 = vpop.eup %902 }
  0xa8   :  { %v905_v52 = vpop.eup %904  ;;  %v115_v54 = vmul.f32 %v903_v50, %v113_v48 }
  0xa9   :  { %v114_v55 = vmul.f32 %v905_v52, %v112_v51 }
  0xaa   :  { %v118_v56 = vmul.f32 %v890_v49, %v115_v54 }
  0xab   :  { %v117_v57 = vmul.f32 %v890_v49, %v114_v55 }
  0xac   :  { %v121_v58 = vadd.f32 %v891_v53, %v118_v56 }
  0xad   :  { %v120_v59 = vadd.f32 %v891_v53, %v117_v57 }
  0xae   :  { %814 = vmatmul.msk.f32.vlgmr.msra.gmra.mxu3 %vm59_vm0, %v121_v58 }
  0xaf   :  { %813 = vmatmul.msk.f32.vlgmr.msra.gmra.mxu0 %vm59_vm0, %v120_v59 }
 0x12c   :  { %v146_v63 = vpop.f32.mrf.mxu0 }
 0x12d   :  { %v1075_v2 = vadd.f32 %v892_v60, %v146_v63 }
 0x131   :  { %v149_v61 = vpop.f32.mrf.mxu3 }
 0x132   :  { %v1072_v62 = vadd.f32 %v892_v60, %v149_v61 }
 0x134   :  { %156 = vrot.lane.b32.xlu2 %v1072_v62, %s1001_s28  ;;  %v1100_v13 = vpack.i.bf16 %v1075_v2, %v1072_v62 }
 0x13c   :  { %154 = vrot.lane.b32.xlu2 %v1075_v2, %s1001_s28 }
 0x18e   :  { %v157_v3 = vpop.permute.xlu2 %156 }
 0x18f   :  { %815 = vmatpush.xpose.msk.msra.mxu1 %vm158_vm5, %v157_v3 }
 0x196   :  { %v155_v4 = vpop.permute.xlu2 %154 }
 0x197   :  { %816 = vmatpush.xpose.msk.msra.mxu1 %vm158_vm5, %v155_v4 }
 0x19a   :  { %817 = vmatmul.msk.f32.vlgmr.msra.gmra.mxu1 %vm158_vm5, %v1075_v2 }
 0x19b   :  { %396 = vmatpush.msrb.mxu1 %v248_v17 }
 0x1a2   :  { %818 = vmatmul.msk.f32.gmra.mxu1 %vm158_vm5, %v1072_v62 }
 0x217   :  { %v184_v6 = vpop.f32.mrf.mxu1 }
 0x218   :  { %v185_v7 = vadd.f32 %v184_v6, %v1087_v5 }
 0x21a   :  { %v191_v8 = vsel %vm190_vm6, %v185_v7, -inf }
 0x21b   :  { %192 = vmax.xlane.f32.xlu0 %v191_v8 }
 0x21f   :  { %v187_v10 = vpop.f32.mrf.mxu1 }
 0x220   :  { %v188_v11 = vadd.f32 %v187_v10, %v1094_v9 }
 0x222   :  { %v194_v12 = vsel %vm190_vm6, %v188_v11, -inf }
 0x223   :  { %195 = vmax.xlane.f32.xlu1 %v194_v12 }
 0x22f   :  { %871 = vrot.lane.b32.xlu0 %v1100_v13, %s1002_s6 }
 0x237   :  { %253 = vrot.lane.b32.xlu0 %v1075_v2, %s1003_s7 }
 0x23f   :  { %249 = vrot.lane.b32.xlu0 %v1075_v2, %s1004_s8 }
 0x247   :  { %538 = vrot.lane.b32.xlu0 %v1072_v62, %s1005_s0 }
 0x24f   :  { %536 = vrot.lane.b32.xlu0 %v1075_v2, %s1005_s0 }
 0x257   :  { %532 = vrot.lane.b32.xlu0 %v1075_v2, %s1006_s9 }
 0x28e   :  { %v193_v14 = vpop.xlane.xlu0 %192 }
 0x28f   :  { %v197_v15 = vsub.f32 %v185_v7, %v193_v14 }
 0x291   :  { %v199_v16 = vmul.f32 1.442695, %v197_v15 }
 0x293   :  { %906 = vpow2.f32 %v199_v16 }
 0x296   :  { %v196_v18 = vpop.xlane.xlu1 %195 }
 0x297   :  { %v198_v19 = vsub.f32 %v188_v11, %v196_v18 }
 0x299   :  { %v907_v20 = vpop.eup %906  ;;  %v201_v21 = vmul.f32 1.442695, %v198_v19 }
 0x29a   :  { %v203_v22 = vsel %vm190_vm6, %v907_v20, 0.0 }
 0x29b   :  { %908 = vpow2.f32 %v201_v21  ;;  %204 = vadd.xlane.f32.xlu2 %v203_v22 }
 0x2a1   :  { %v909_v23 = vpop.eup %908  ;;  %v872_v24 = vpop.permute.xlu0 %871 }
 0x2a2   :  { %v206_v25 = vsel %vm190_vm6, %v909_v23, 0.0  ;;  %v873_v26 = vunpack.i.l.bf16 %v872_v24  ;;  %v874_v27 = vunpack.i.h.bf16 %v872_v24 }
 0x2a3   :  { %207 = vadd.xlane.f32.xlu1 %v206_v25 }
 0x2a4   :  { %239 = vmatpush.msra.mxu2 %v873_v26 }
 0x2a6   :  { %240 = vmatpush.msra.mxu2 %v874_v27 }
 0x2a9   :  { %v254_v28 = vpop.permute.xlu0 %253 }
 0x2b1   :  { %v250_v29 = vpop.permute.xlu0 %249 }
 0x2b3   :  { %410 = vrot.lane.b32.xlu2 %v1072_v62, %s1007_s10 }
 0x2b9   :  { %v539_v30 = vpop.permute.xlu0 %538 }
 0x2ba   :  { %839 = vmatpush.xpose.msk.msra.mxu1 %vm158_vm5, %v539_v30 }
 0x2bb   :  { %534 = vrot.lane.b32.xlu2 %v1072_v62, %s1006_s9 }
 0x2bc   :  { %255 = vrot.lane.b32.xlu1 %v1072_v62, %s1003_s7 }
 0x2c1   :  { %v537_v31 = vpop.permute.xlu0 %536 }
 0x2c2   :  { %840 = vmatpush.xpose.msk.msra.mxu1 %vm158_vm5, %v537_v31 }
 0x2c4   :  { %251 = vrot.lane.b32.xlu1 %v1072_v62, %s1004_s8 }
 0x2c9   :  { %v533_v46 = vpop.permute.xlu0 %532 }
 0x2cc   :  { %408 = vrot.lane.b32.xlu1 %v1075_v2, %s1007_s10 }
 0x2d4   :  { %404 = vrot.lane.b32.xlu1 %v1075_v2, %s1008_s11 }
 0x2dc   :  { %406 = vrot.lane.b32.xlu1 %v1072_v62, %s1008_s11 }
 0x30e   :  { %v205_v32 = vpop.xlane.xlu2 %204 }
 0x30f   :  { %910 = vrcp.f32 %v205_v32 }
 0x315   :  { %v911_v33 = vpop.eup %910 }
 0x316   :  { %v208_v34 = vpop.xlane.xlu1 %207  ;;  %v211_v35 = vmul.f32 %v911_v33, %v907_v20  ;;  %v411_v39 = vpop.permute.xlu2 %410 }
 0x317   :  { %912 = vrcp.f32 %v208_v34 }
 0x318   :  { %819 = vmatmul.msk.f32.vlgmr.msra.gmra.mxu2 %vm190_vm6, %v211_v35 }
 0x31d   :  { %v913_v36 = vpop.eup %912 }
 0x31e   :  { %v212_v37 = vmul.f32 %v913_v36, %v909_v23  ;;  %v535_v47 = vpop.permute.xlu2 %534 }
 0x320   :  { %820 = vmatmul.msk.f32.gmra.mxu2 %vm190_vm6, %v212_v37 }
 0x32e   :  { %v256_v38 = vpop.permute.xlu1 %255 }
 0x32f   :  { %821 = vmatpush.xpose.msk.msrb.mxu3 %vm158_vm5, %v256_v38 }
 0x333   :  { %822 = vmatpush.xpose.msk.msrb.mxu3 %vm158_vm5, %v254_v28 }
 0x336   :  { %v252_v40 = vpop.permute.xlu1 %251  ;;  %823 = vmatmul.msk.f32.vlgmr.msrb.gmra.mxu3 %vm158_vm5, %v250_v29 }
 0x337   :  { %831 = vmatpush.xpose.msk.msra.mxu3 %vm158_vm5, %v411_v39 }
 0x33e   :  { %v409_v41 = vpop.permute.xlu1 %408  ;;  %824 = vmatmul.msk.f32.gmra.mxu3 %vm158_vm5, %v252_v40 }
 0x33f   :  { %832 = vmatpush.xpose.msk.msra.mxu3 %vm158_vm5, %v409_v41 }
 0x346   :  { %v405_v42 = vpop.permute.xlu1 %404 }
 0x347   :  { %833 = vmatmul.msk.f32.vlgmr.msra.gmra.mxu3 %vm158_vm5, %v405_v42 }
 0x34e   :  { %v407_v43 = vpop.permute.xlu1 %406 }
 0x34f   :  { %834 = vmatmul.msk.f32.gmra.mxu3 %vm158_vm5, %v407_v43 }
 0x39b   :  { %v242_v44 = vpop.f32.mrf.mxu2 }
 0x39c   :  { %829 = vmatmul.msk.f32.vlgmr.msrb.gmra.mxu1 %vm158_vm5, %v242_v44 }
 0x3a3   :  { %v245_v45 = vpop.f32.mrf.mxu2 }
 0x3a4   :  { %830 = vmatmul.msk.f32.gmra.mxu1 %vm158_vm5, %v245_v45 }
 0x3ac   :  { %841 = vmatmul.msk.f32.vlgmr.msra.gmra.mxu1 %vm158_vm5, %v533_v46 }
 0x3b4   :  { %842 = vmatmul.msk.f32.gmra.mxu1 %vm158_vm5, %v535_v47 }
 0x3b9   :  { %v282_v48 = vpop.f32.mrf.mxu3 }
 0x3ba   :  { %v283_v49 = vadd.f32 %v282_v48, %v1087_v5 }
 0x3bc   :  { %v288_v50 = vsel %vm190_vm6, %v283_v49, -inf }
 0x3bd   :  { %289 = vmax.xlane.f32.xlu0 %v288_v50 }
 0x3c1   :  { %v285_v51 = vpop.f32.mrf.mxu3 }
 0x3c2   :  { %v286_v52 = vadd.f32 %v285_v51, %v1094_v9 }
 0x3c4   :  { %v291_v53 = vsel %vm190_vm6, %v286_v52, -inf }
 0x3c5   :  { %292 = vmax.xlane.f32.xlu1 %v291_v53 }
 0x3ca   :  { %v437_v54 = vpop.f32.mrf.mxu3 }
 0x3cb   :  { %v438_v55 = vadd.f32 %v437_v54, %v1087_v5 }
 0x3cd   :  { %v443_v56 = vsel %vm190_vm6, %v438_v55, -inf }
 0x3ce   :  { %444 = vmax.xlane.f32.xlu0 %v443_v56  ;;  %v628_v56 = vld [vmem:[#allocation2 + $0x38] sm:$0xff] }
 0x3d2   :  { %v440_v57 = vpop.f32.mrf.mxu3 }
 0x3d3   :  { %v441_v58 = vadd.f32 %v440_v57, %v1094_v9 }
 0x3d5   :  { %v446_v59 = vsel %vm190_vm6, %v441_v58, -inf }
 0x3d6   :  { %447 = vmax.xlane.f32.xlu1 %v446_v59 }
 0x419   :  { %v1145_v60 = vpop.f32.mrf.mxu1 }
 0x421   :  { %v1147_v61 = vpop.f32.mrf.mxu1 }
 0x429   :  { %v565_v62 = vpop.f32.mrf.mxu1 }
 0x42a   :  { %v566_v63 = vadd.f32 %v565_v62, %v1087_v5 }
 0x42c   :  { %v571_v2 = vsel %vm190_vm6, %v566_v63, -inf }
 0x42d   :  { %572 = vmax.xlane.f32.xlu2 %v571_v2 }
 0x430   :  { %v290_v3 = vpop.xlane.xlu0 %289 }
 0x431   :  { %v294_v4 = vsub.f32 %v283_v49, %v290_v3  ;;  %v568_v6 = vpop.f32.mrf.mxu1 }
 0x432   :  { %v569_v7 = vadd.f32 %v568_v6, %v1094_v9 }
 0x433   :  { %v296_v8 = vmul.f32 1.442695, %v294_v4 }
 0x434   :  { %v574_v10 = vsel %vm190_vm6, %v569_v7, -inf }
 0x435   :  { %914 = vpow2.f32 %v296_v8  ;;  %575 = vmax.xlane.f32.xlu2 %v574_v10 }
 0x438   :  { %v293_v11 = vpop.xlane.xlu1 %292 }
 0x439   :  { %v295_v12 = vsub.f32 %v286_v52, %v293_v11  ;;  %v345_v52 = vld [vmem:[#allocation2 + $0x28] sm:$0xff] }
 0x43a   :  { %367 = vmatpush.msrb.mxu0 %v345_v52 }
 0x43b   :  { %v915_v14 = vpop.eup %914  ;;  %v298_v15 = vmul.f32 1.442695, %v295_v12 }
 0x43c   :  { %v300_v16 = vsel %vm190_vm6, %v915_v14, 0.0 }
 0x43d   :  { %916 = vpow2.f32 %v298_v15  ;;  %301 = vadd.xlane.f32.xlu0 %v300_v16 }
 0x441   :  { %v445_v5 = vpop.xlane.xlu0 %444 }
 0x442   :  { %v449_v17 = vsub.f32 %v438_v55, %v445_v5  ;;  %v500_v55 = vld [vmem:[#allocation2 + $0x30] sm:$0xff] }
 0x443   :  { %v917_v18 = vpop.eup %916  ;;  %522 = vmatpush.msra.mxu0 %v500_v55 }
 0x444   :  { %v451_v19 = vmul.f32 1.442695, %v449_v17  ;;  %v303_v20 = vsel %vm190_vm6, %v917_v18, 0.0 }
 0x445   :  { %304 = vadd.xlane.f32.xlu1 %v303_v20 }
 0x446   :  { %918 = vpow2.f32 %v451_v19 }
 0x449   :  { %v448_v25 = vpop.xlane.xlu1 %447 }
 0x44a   :  { %v450_v29 = vsub.f32 %v441_v58, %v448_v25 }
 0x44c   :  { %v919_v9 = vpop.eup %918  ;;  %v453_v32 = vmul.f32 1.442695, %v450_v29 }
 0x44d   :  { %876 = vrot.lane.b32.xlu2 %v1100_v13, %s1009_s12  ;;  %v455_v21 = vsel %vm190_vm6, %v919_v9, 0.0 }
 0x44e   :  { %456 = vadd.xlane.f32.xlu1 %v455_v21 }
 0x455   :  { %886 = vrot.lane.b32.xlu2 %v1100_v13, %s1010_s13 }
 0x4a0   :  { %v573_v22 = vpop.xlane.xlu2 %572 }
 0x4a1   :  { %v577_v23 = vsub.f32 %v566_v63, %v573_v22 }
 0x4a3   :  { %v579_v24 = vmul.f32 1.442695, %v577_v23 }
 0x4a5   :  { %920 = vpow2.f32 %v579_v24 }
 0x4a8   :  { %v576_v26 = vpop.xlane.xlu2 %575 }
 0x4a9   :  { %v578_v27 = vsub.f32 %v569_v7, %v576_v26 }
 0x4ab   :  { %v921_v28 = vpop.eup %920  ;;  %v581_v30 = vmul.f32 1.442695, %v578_v27 }
 0x4ac   :  { %v583_v31 = vsel %vm190_vm6, %v921_v28, 0.0 }
 0x4ad   :  { %922 = vpow2.f32 %v581_v30  ;;  %584 = vadd.xlane.f32.xlu0 %v583_v31 }
 0x4b0   :  { %v302_v33 = vpop.xlane.xlu0 %301  ;;  %v877_v34 = vpop.permute.xlu2 %876 }
 0x4b1   :  { %924 = vrcp.f32 %v302_v33  ;;  %v878_v35 = vunpack.i.l.bf16 %v877_v34  ;;  %v879_v37 = vunpack.i.h.bf16 %v877_v34  ;;  %v42_v33 = vld [vmem:[#allocation2 + $0x58] sm:$0xff]  ;;  %v41_v34 = vld [vmem:[#allocation2 + $0x50] sm:$0xff] }
 0x4b2   :  { %926 = vpow2.f32 %v453_v32 }
 0x4b3   :  { %v923_v36 = vpop.eup %922  ;;  %336 = vmatpush.msrb.mxu2 %v878_v35 }
 0x4b4   :  { %v586_v38 = vsel %vm190_vm6, %v923_v36, 0.0 }
 0x4b5   :  { %587 = vadd.xlane.f32.xlu1 %v586_v38  ;;  %337 = vmatpush.msrb.mxu2 %v879_v37 }
 0x4b7   :  { %v925_v39 = vpop.eup %924 }
 0x4b8   :  { %v305_v40 = vpop.xlane.xlu1 %304  ;;  %v887_v41 = vpop.permute.xlu2 %886  ;;  %v308_v42 = vmul.f32 %v925_v39, %v915_v14 }
 0x4b9   :  { %v927_v43 = vpop.eup %926  ;;  %928 = vrcp.f32 %v305_v40  ;;  %v888_v44 = vunpack.i.l.bf16 %v887_v41  ;;  %v889_v45 = vunpack.i.h.bf16 %v887_v41 }
 0x4ba   :  { %825 = vmatmul.msk.f32.vlgmr.msrb.gmra.mxu2 %vm190_vm6, %v308_v42  ;;  %v458_v46 = vsel %vm190_vm6, %v927_v43, 0.0 }
 0x4bb   :  { %491 = vmatpush.msra.mxu2 %v888_v44 }
 0x4bd   :  { %459 = vadd.xlane.f32.xlu1 %v458_v46  ;;  %492 = vmatpush.msra.mxu2 %v889_v45 }
 0x4bf   :  { %v929_v47 = vpop.eup %928  ;;  %650 = vmatpush.msrb.mxu2 %v628_v56  ;;  %v50_v56 = vld [vmem:[#allocation2 + $0x98] sm:$0xff] }
 0x4c0   :  { %v309_v48 = vmul.f32 %v929_v47, %v917_v18  ;;  %775 = vmatpush.msrb.mxu1 %v50_v56 }
 0x4c1   :  { %v457_v49 = vpop.xlane.xlu1 %456  ;;  %881 = vrot.lane.b32.xlu0 %v1100_v13, %s1011_s14 }
 0x4c2   :  { %930 = vrcp.f32 %v457_v49  ;;  %826 = vmatmul.msk.f32.gmra.mxu2 %vm190_vm6, %v309_v48 }
 0x4c8   :  { %v931_v50 = vpop.eup %930 }
 0x4c9   :  { %v463_v51 = vmul.f32 %v931_v50, %v919_v9  ;;  %v893_v9 = vld [vmem:[%s1223_s2 + $0x1] ss:$0 sm:$0xff] }
 0x4cb   :  { %835 = vmatmul.msk.f32.vlgmr.msra.gmra.mxu2 %vm190_vm6, %v463_v51 }
 0x520   :  { %v585_v54 = vpop.xlane.xlu0 %584 }
 0x521   :  { %932 = vrcp.f32 %v585_v54 }
 0x527   :  { %v933_v13 = vpop.eup %932 }
 0x528   :  { %v588_v53 = vpop.xlane.xlu1 %587  ;;  %v591_v2 = vmul.f32 %v933_v13, %v921_v28 }
 0x530   :  { %v460_v57 = vpop.xlane.xlu1 %459 }
 0x531   :  { %934 = vrcp.f32 %v460_v57  ;;  %v49_v57 = vld [vmem:[#allocation2 + $0x90] sm:$0xff] }
 0x532   :  { %936 = vrcp.f32 %v588_v53  ;;  %776 = vmatpush.msrb.mxu1 %v49_v57 }
 0x533   :  { %v882_v58 = vpop.permute.xlu0 %881 }
 0x534   :  { %v883_v59 = vunpack.i.l.bf16 %v882_v58  ;;  %v884_v62 = vunpack.i.h.bf16 %v882_v58 }
 0x536   :  { %619 = vmatpush.msrb.mxu3 %v883_v59 }
 0x537   :  { %v935_v63 = vpop.eup %934 }
 0x538   :  { %620 = vmatpush.msrb.mxu3 %v884_v62  ;;  %v464_v3 = vmul.f32 %v935_v63, %v927_v43  ;;  %v937_v4 = vpop.eup %936  ;;  %v48_v62 = vld [vmem:[#allocation2 + $0x88] sm:$0xff] }
 0x539   :  { %843 = vmatmul.msk.f32.vlgmr.msrb.gmra.mxu3 %vm190_vm6, %v591_v2  ;;  %v592_v7 = vmul.f32 %v937_v4, %v923_v36  ;;  %v40_v36 = vld [vmem:[#allocation2 + $0x48] sm:$0xff]  ;;  %v47_v4 = vld [vmem:[#allocation2 + $0x80] sm:$0xff]  ;;  %777 = vmatpush.msrb.mxu1 %v48_v62 }
 0x53a   :  { %836 = vmatmul.msk.f32.gmra.mxu2 %vm190_vm6, %v464_v3 }
 0x53b   :  { %778 = vmatpush.msrb.mxu1 %v47_v4 }
 0x53d   :  { %v339_v6 = vpop.f32.mrf.mxu2 }
 0x53e   :  { %827 = vmatmul.msk.f32.vlgmr.msrb.gmra.mxu0 %vm158_vm5, %v339_v6 }
 0x53f   :  { %746 = vmatpush.msrb.mxu0 %v42_v33 }
 0x541   :  { %844 = vmatmul.msk.f32.gmra.mxu3 %vm190_vm6, %v592_v7  ;;  %747 = vmatpush.msrb.mxu0 %v41_v34 }
 0x543   :  { %748 = vmatpush.msrb.mxu0 %v40_v36 }
 0x545   :  { %v342_v8 = vpop.f32.mrf.mxu2 }
 0x546   :  { %828 = vmatmul.msk.f32.gmra.mxu0 %vm158_vm5, %v342_v8  ;;  %v46_v8 = vld [vmem:[#allocation2 + $0x78] sm:$0xff] }
 0x547   :  { %779 = vmatpush.msrb.mxu1 %v46_v8 }
 0x54e   :  { %v494_v10 = vpop.f32.mrf.mxu2 }
 0x54f   :  { %837 = vmatmul.msk.f32.vlgmr.msra.gmra.mxu0 %vm158_vm5, %v494_v10 }
 0x5bb   :  { %v369_v15 = vpop.f32.mrf.mxu0 }
 0x5bc   :  { %v622_v11 = vpop.f32.mrf.mxu3  ;;  %v399_v17 = vadd.f32 %v1145_v60, %v369_v15  ;;  %v894_v15 = vld [vmem:[%s1223_s2 + $0x6] ss:$0 sm:$0xff] }
 0x5bd   :  { %v497_v12 = vpop.f32.mrf.mxu2  ;;  %845 = vmatmul.msk.f32.vlgmr.msrb.gmra.mxu2 %vm158_vm5, %v622_v11 }
 0x5be   :  { %838 = vmatmul.msk.f32.gmra.mxu0 %vm158_vm5, %v497_v12 }
 0x5c3   :  { %v372_v16 = vpop.f32.mrf.mxu0 }
 0x5c4   :  { %v625_v14 = vpop.f32.mrf.mxu3  ;;  %v402_v23 = vadd.f32 %v1147_v61, %v372_v16 }
 0x5c5   :  { %846 = vmatmul.msk.f32.gmra.mxu2 %vm158_vm5, %v625_v14 }
 0x5cc   :  { %v524_v5 = vpop.f32.mrf.mxu0 }
 0x5cd   :  { %v530_v18 = vadd.f32 %v524_v5, %v399_v17 }
 0x63b   :  { %v527_v22 = vpop.f32.mrf.mxu0 }
 0x63c   :  { %v531_v25 = vadd.f32 %v527_v22, %v402_v23 }
 0x640   :  { %v652_v19 = vpop.f32.mrf.mxu2 }
 0x641   :  { %v658_v20 = vadd.f32 %v652_v19, %v530_v18  ;;  %v895_v18 = vld [vmem:[%s1223_s2 + $0x7] ss:$0 sm:$0xff] }
 0x643   :  { %v660_v21 = vadd.f32 %v658_v20, %v1047_v1 }
 0x645   :  { %v1180_v24 = vadd.f32 %v893_v9, %v660_v21 }
 0x647   :  { %v665_v26 = vsel %vm59_vm0, %v1180_v24, 0.0  ;;  %v671_v60 = vmul.f32 %v1180_v24, %v1180_v24 }
 0x648   :  { %v655_v27 = vpop.f32.mrf.mxu2  ;;  %666 = vadd.xlane.f32.xlu0 %v665_v26 }
 0x649   :  { %v659_v28 = vadd.f32 %v655_v27, %v531_v25  ;;  %v673_v29 = vsel %vm59_vm0, %v671_v60, 0.0 }
 0x64a   :  { %674 = vadd.xlane.f32.xlu2 %v673_v29  ;;  %v45_v29 = vld [vmem:[#allocation2 + $0x70] sm:$0xff] }
 0x64b   :  { %v661_v1 = vadd.f32 %v659_v28, %v1042_v0  ;;  %v39_v0 = vld [vmem:[#allocation2 + $0x40] sm:$0xff]  ;;  %780 = vmatpush.msrb.mxu1 %v45_v29 }
 0x64c   :  { %749 = vmatpush.msrb.mxu0 %v39_v0  ;;  %v897_v0 = vld [vmem:[%s1223_s2 + $0x3] ss:$0 sm:$0xff] }
 0x64d   :  { %v1188_v30 = vadd.f32 %v893_v9, %v661_v1  ;;  %v44_v1 = vld [vmem:[#allocation2 + $0x68] sm:$0xff] }
 0x64e   :  { %781 = vmatpush.msrb.mxu1 %v44_v1 }
 0x64f   :  { %v668_v61 = vsel %vm59_vm0, %v1188_v30, 0.0  ;;  %v672_v31 = vmul.f32 %v1188_v30, %v1188_v30 }
 0x650   :  { %669 = vadd.xlane.f32.xlu1 %v668_v61  ;;  %v43_v61 = vld [vmem:[#allocation2 + $0x60] sm:$0xff] }
 0x651   :  { %v676_v32 = vsel %vm59_vm0, %v672_v31, 0.0  ;;  %782 = vmatpush.msrb.mxu1 %v43_v61  ;;  %v896_v31 = vld [vmem:[%s1223_s2 + $0x2] ss:$0 sm:$0xff] }
 0x658   :  { %677 = vadd.xlane.f32.xlu1 %v676_v32 }
 0x6bb   :  { %v667_v35 = vpop.xlane.xlu0 %666 }
 0x6bc   :  { %v679_v37 = vmul.f32 0.03125, %v667_v35 }
 0x6bd   :  { %v675_v39 = vpop.xlane.xlu2 %674 }
 0x6be   :  { %v681_v38 = vmul.f32 %v679_v37, %v667_v35  ;;  %v717_v14 = vsub.f32 %v1180_v24, %v679_v37 }
 0x6c0   :  { %v683_v40 = vsub.f32 %v675_v39, %v681_v38 }
 0x6c2   :  { %v685_v41 = vmax.f32 %v683_v40, 0.0 }
 0x6c3   :  { %v670_v42 = vpop.xlane.xlu1 %669 }
 0x6c4   :  { %v687_v43 = vmul.f32 0.032258064, %v685_v41  ;;  %v680_v44 = vmul.f32 0.03125, %v670_v42 }
 0x6c6   :  { %938 = vrsqrt.f32 %v687_v43  ;;  %v682_v45 = vmul.f32 %v680_v44, %v670_v42  ;;  %vm696_vm7 = vcmp.eq.f32.partialorder %v687_v43, inf  ;;  %v699_v59 = vand.u32 2147483648, %v687_v43 }
 0x6c7   :  { %vm698_vm8 = vcmp.eq.f32.partialorder %v687_v43, 0.0  ;;  %v718_v25 = vsub.f32 %v1188_v30, %v680_v44 }
 0x6cb   :  { %v678_v46 = vpop.xlane.xlu1 %677 }
 0x6cc   :  { %v939_v47 = vpop.eup %938  ;;  %v684_v48 = vsub.f32 %v678_v46, %v682_v45 }
 0x6cd   :  { %v690_v49 = vmul.f32 %v939_v47, %v687_v43 }
 0x6ce   :  { %v686_v50 = vmax.f32 %v684_v48, 0.0 }
 0x6cf   :  { %v691_v51 = vmul.f32 %v939_v47, %v690_v49 }
 0x6d0   :  { %v688_v52 = vmul.f32 0.032258064, %v686_v50 }
 0x6d1   :  { %v692_v53 = vmul.f32 0.5, %v691_v51 }
 0x6d2   :  { %940 = vrsqrt.f32 %v688_v52  ;;  %vm708_vm9 = vcmp.eq.f32.partialorder %v688_v52, inf  ;;  %v711_v19 = vand.u32 2147483648, %v688_v52  ;;  %vm710_vm10 = vcmp.eq.f32.partialorder %v688_v52, 0.0 }
 0x6d3   :  { %v693_v54 = vsub.f32 1.5, %v692_v53 }
 0x6d5   :  { %v694_v55 = vmul.f32 %v939_v47, %v693_v54 }
 0x6d7   :  { %v695_v58 = vmul.f32 %v694_v55, %v687_v43 }
 0x6d8   :  { %v941_v13 = vpop.eup %940 }
 0x6d9   :  { %v702_v63 = vmul.f32 %v941_v13, %v688_v52  ;;  %v697_v2 = vsel %vm696_vm7, %v687_v43, %v695_v58 }
 0x6da   :  { %v700_v3 = vsel %vm698_vm8, %v699_v59, %v697_v2 }
 0x6db   :  { %v713_v6 = vadd.f32 1e-06, %v700_v3  ;;  %v703_v7 = vmul.f32 %v941_v13, %v702_v63 }
 0x6dd   :  { %942 = vrcp.f32 %v713_v6  ;;  %v704_v10 = vmul.f32 0.5, %v703_v7 }
 0x6df   :  { %v705_v11 = vsub.f32 1.5, %v704_v10 }
 0x6e1   :  { %v706_v12 = vmul.f32 %v941_v13, %v705_v11 }
 0x6e3   :  { %v943_v16 = vpop.eup %942  ;;  %v707_v5 = vmul.f32 %v706_v12, %v688_v52 }
 0x6e4   :  { %v719_v17 = vmul.f32 %v943_v16, %v717_v14 }
 0x6e5   :  { %v709_v20 = vsel %vm708_vm9, %v688_v52, %v707_v5 }
 0x6e6   :  { %v722_v9 = vmul.f32 %v894_v15, %v719_v17  ;;  %v712_v21 = vsel %vm710_vm10, %v711_v19, %v709_v20 }
 0x6e7   :  { %v714_v22 = vadd.f32 1e-06, %v712_v21 }
 0x6e8   :  { %v725_v23 = vadd.f32 %v895_v18, %v722_v9 }
 0x6e9   :  { %944 = vrcp.f32 %v714_v22 }
 0x6ea   :  { %847 = vmatmul.msk.f32.vlgmr.msrb.gmra.mxu0 %vm59_vm0, %v725_v23 }
 0x6ef   :  { %v945_v26 = vpop.eup %944 }
 0x6f0   :  { %v720_v60 = vmul.f32 %v945_v26, %v718_v25 }
 0x6f2   :  { %v723_v27 = vmul.f32 %v894_v15, %v720_v60 }
 0x6f4   :  { %v726_v28 = vadd.f32 %v895_v18, %v723_v27 }
 0x6f6   :  { %848 = vmatmul.msk.f32.gmra.mxu0 %vm59_vm0, %v726_v28 }
 0x767   :  { %v751_v32 = vpop.f32.mrf.mxu0 }
 0x768   :  { %v752_v33 = vadd.f32 %v896_v31, %v751_v32 }
 0x76a   :  { %v757_v34 = vmax.f32 %v752_v33, 0.0 }
 0x76c   :  { %849 = vmatmul.msk.f32.vlgmr.msrb.gmra.mxu1 %vm760_vm11, %v757_v34 }
 0x773   :  { %v754_v35 = vpop.f32.mrf.mxu0 }
 0x774   :  { %v755_v36 = vadd.f32 %v896_v31, %v754_v35 }
 0x776   :  { %v758_v37 = vmax.f32 %v755_v36, 0.0 }
 0x778   :  { %850 = vmatmul.msk.f32.gmra.mxu1 %vm760_vm11, %v758_v37 }
 0x7e9   :  { %v784_v38 = vpop.f32.mrf.mxu1 }
 0x7ea   :  { %v785_v39 = vadd.f32 %v897_v0, %v784_v38 }
 0x7ec   :  { %v790_v40 = vadd.f32 %v785_v39, %v1180_v24 }
 0x7ee   :  { %792 = vst.msk [vmem:[#allocation5] sm:$0xff] %vm59_vm0, %v790_v40 }
 0x7f5   :  { %v787_v41 = vpop.f32.mrf.mxu1 }
 0x7f6   :  { %v788_v42 = vadd.f32 %v897_v0, %v787_v41 }
 0x7f8   :  { %v791_v43 = vadd.f32 %v788_v42, %v1188_v30 }
 0x7fa   :  { %793 = vst.msk [vmem:[#allocation5 + $0x8] sm:$0xff] %vm59_vm0, %v791_v43 }
 0x7fb   :  { %806 = dma.vmem_to_hbm [thread:$0]  %s799_s27, 256, %s801_s30, [#allocation4], %s999_s17, %s999_s17, %s1000_s18  }
 0x7fc   :  { %996 = dma.done.wait [#allocation4], 256  }
 0x7fd   :  { %997 = vsyncadd [#allocation4], 4294967040 }
 0x7fe   :  { %811 = vsyncpa [#allocation3], 1 }
 0x7ff   :  { %812 = vsyncpa [#allocation4], 1 }

</bundles_post_ra>
